<compile_context>
chip_gen: v5e
topology: v5e:2x2
jax: 0.10.0
libtpu: 0.0.40
codegen_flags: <defaults>
</compile_context>

<pallas_src>
import jax
import jax.numpy as jnp
from jax.experimental import pallas as pl
from jax.experimental.pallas import tpu as pltpu


def _chained_mm_kernel(x1_ref, x2_ref, x3_ref, v2_ref, y_ref):
    x1 = x1_ref[...]
    # v1 = x1 @ x2  (MXU, f32 accumulation)
    v1 = jnp.dot(x1, x2_ref[...], preferred_element_type=jnp.float32)
    # v2 = v1 @ x3  -- keep v1 in f32 (no downcast) so precision matches the
    # f32-throughout PyTorch reference even if inputs are narrower.
    v2 = jnp.dot(v1, x3_ref[...], preferred_element_type=jnp.float32)
    v2_ref[...] = v2.astype(v2_ref.dtype)
    # y = x1 + v2 (residual add in f32, single cast on store)
    y_ref[...] = (x1.astype(jnp.float32) + v2).astype(y_ref.dtype)


def chained_mm(x1, x2, x3, *, tm=128):
    """Returns (v2, x1 + v2), exactly like the PyTorch module."""
    M, K = x1.shape
    K2, N = x2.shape
    N2, K3 = x3.shape
    assert K == K2 and N == N2 and K3 == K, "shape mismatch for chained mm"

    # Row tile: prefer an MXU-friendly 128-row tile; fall back to the full
    # extent when M is small or not divisible (full-extent blocks are always
    # legal block shapes).
    if M % tm != 0 or M < tm:
        tm = M
    grid = (M // tm,)

    itemsize = jnp.dtype(x1.dtype).itemsize
    flops = 2 * M * K * N + 2 * M * N * K          # two chained matmuls
    bytes_accessed = (x1.size + x2.size + x3.size + 2 * M * K) * itemsize

    out_shapes = (
        jax.ShapeDtypeStruct((M, K), x1.dtype),    # v2
        jax.ShapeDtypeStruct((M, K), x1.dtype),    # y = x1 + v2
    )

    return pl.pallas_call(
        _chained_mm_kernel,
        out_shape=out_shapes,
        grid_spec=pltpu.PrefetchScalarGridSpec(
            num_scalar_prefetch=0,
            grid=grid,
            in_specs=[
                pl.BlockSpec((tm, K), lambda i: (i, 0)),   # x1 row tiles (streamed)
                pl.BlockSpec((K, N), lambda i: (0, 0)),    # x2 resident
                pl.BlockSpec((N, K), lambda i: (0, 0)),    # x3 resident
            ],
            out_specs=[
                pl.BlockSpec((tm, K), lambda i: (i, 0)),   # v2 row tiles
                pl.BlockSpec((tm, K), lambda i: (i, 0)),   # y row tiles
            ],
        ),
        compiler_params=pltpu.CompilerParams(
            dimension_semantics=("parallel",),
            vmem_limit_bytes=64 * 1024 * 1024,
        ),
        cost_estimate=pl.CostEstimate(
            flops=flops, bytes_accessed=bytes_accessed, transcendentals=0),
    )(x1, x2, x3)


if __name__ == "__main__":
    key = jax.random.PRNGKey(0)
    k1, k2, k3 = jax.random.split(key, 3)

    # Small but grid-exercising shapes: x1:(M,K), x2:(K,N), x3:(N,K)
    # M=256 with TM=128 -> 2 grid steps (pipelined, megacore-shardable).
    M, K, N = 256, 128, 128
    x1 = jax.random.normal(k1, (M, K), dtype=jnp.float32)
    x2 = jax.random.normal(k2, (K, N), dtype=jnp.float32)
    x3 = jax.random.normal(k3, (N, K), dtype=jnp.float32)

    v2, y = chained_mm(x1, x2, x3)
    jax.block_until_ready((v2, y))

    # Reference check against plain JAX
    v2_ref = (x1 @ x2) @ x3
    y_ref = x1 + v2_ref
    assert jnp.allclose(v2, v2_ref, rtol=1e-4, atol=1e-4)
    assert jnp.allclose(y, y_ref, rtol=1e-4, atol=1e-4)

    print("KERNEL_OK")
</pallas_src>

<mosaic_0001>
module attributes {stable_mosaic.version = 11 : i64} {
  func.func @_chained_mm_kernel(%arg0: i32, %arg1: memref<128x128xf32, #tpu.memory_space<vmem>>, %arg2: memref<128x128xf32, #tpu.memory_space<vmem>>, %arg3: memref<128x128xf32, #tpu.memory_space<vmem>>, %arg4: memref<128x128xf32, #tpu.memory_space<vmem>>, %arg5: memref<128x128xf32, #tpu.memory_space<vmem>>) attributes {dimension_semantics = [#tpu.dimension_semantics<parallel>], iteration_bounds = array<i64: 2>, scalar_prefetch = 0 : i64, scratch_operands = 0 : i64, tpu.core_type = #tpu.core_type<tc>, window_params = [{transform_indices = @transform_0, window_bounds = array<i64: 128, 128>}, {pipeline_mode = #tpu.pipeline_mode<synchronous>, transform_indices = @transform_1, window_bounds = array<i64: 128, 128>}, {pipeline_mode = #tpu.pipeline_mode<synchronous>, transform_indices = @transform_2, window_bounds = array<i64: 128, 128>}, {transform_indices = @transform_3, window_bounds = array<i64: 128, 128>}, {transform_indices = @transform_4, window_bounds = array<i64: 128, 128>}]} {
    %c0 = arith.constant 0 : index
    %c0_0 = arith.constant 0 : index
    %0 = vector.load %arg1[%c0, %c0_0] : memref<128x128xf32, #tpu.memory_space<vmem>>, vector<128x128xf32>
    %c0_1 = arith.constant 0 : index
    %c0_2 = arith.constant 0 : index
    %1 = vector.load %arg2[%c0_1, %c0_2] : memref<128x128xf32, #tpu.memory_space<vmem>>, vector<128x128xf32>
    %cst = arith.constant dense<0.000000e+00> : vector<128x128xf32>
    %2 = tpu.matmul %0, %1, %cst {dimension_numbers = #tpu.dot_dimension_numbers<[1], [0], [0], [1], [0, 0, 1, 1], [], []>} : vector<128x128xf32>, vector<128x128xf32>, vector<128x128xf32> -> vector<128x128xf32>
    %c0_3 = arith.constant 0 : index
    %c0_4 = arith.constant 0 : index
    %3 = vector.load %arg3[%c0_3, %c0_4] : memref<128x128xf32, #tpu.memory_space<vmem>>, vector<128x128xf32>
    %cst_5 = arith.constant dense<0.000000e+00> : vector<128x128xf32>
    %4 = tpu.matmul %2, %3, %cst_5 {dimension_numbers = #tpu.dot_dimension_numbers<[1], [0], [0], [1], [0, 0, 1, 1], [], []>} : vector<128x128xf32>, vector<128x128xf32>, vector<128x128xf32> -> vector<128x128xf32>
    %c0_6 = arith.constant 0 : index
    %c0_7 = arith.constant 0 : index
    %5 = vector.load %arg4[%c0_6, %c0_7] : memref<128x128xf32, #tpu.memory_space<vmem>>, vector<128x128xf32>
    tpu.vector_store %arg4[%c0_6, %c0_7], %4 {strides = array<i32>} : memref<128x128xf32, #tpu.memory_space<vmem>>, vector<128x128xf32>,
    %6 = arith.addf %0, %4 : vector<128x128xf32>
    %c0_8 = arith.constant 0 : index
    %c0_9 = arith.constant 0 : index
    %7 = vector.load %arg5[%c0_8, %c0_9] : memref<128x128xf32, #tpu.memory_space<vmem>>, vector<128x128xf32>
    tpu.vector_store %arg5[%c0_8, %c0_9], %6 {strides = array<i32>} : memref<128x128xf32, #tpu.memory_space<vmem>>, vector<128x128xf32>,
    return
  }
  func.func @transform_0(%arg0: i32) -> (i32, i32) {
    %c0_i32 = arith.constant 0 : i32
    %c0_i32_0 = arith.constant 0 : i32
    return %arg0, %c0_i32 : i32, i32
  }
  func.func @transform_1(%arg0: i32) -> (i32, i32) {
    %c0_i32 = arith.constant 0 : i32
    %c0_i32_0 = arith.constant 0 : i32
    %c0_i32_1 = arith.constant 0 : i32
    return %c0_i32, %c0_i32_0 : i32, i32
  }
  func.func @transform_2(%arg0: i32) -> (i32, i32) {
    %c0_i32 = arith.constant 0 : i32
    %c0_i32_0 = arith.constant 0 : i32
    %c0_i32_1 = arith.constant 0 : i32
    return %c0_i32, %c0_i32_0 : i32, i32
  }
  func.func @transform_3(%arg0: i32) -> (i32, i32) {
    %c0_i32 = arith.constant 0 : i32
    %c0_i32_0 = arith.constant 0 : i32
    return %arg0, %c0_i32 : i32, i32
  }
  func.func @transform_4(%arg0: i32) -> (i32, i32) {
    %c0_i32 = arith.constant 0 : i32
    %c0_i32_0 = arith.constant 0 : i32
    return %arg0, %c0_i32 : i32, i32
  }
}

</mosaic_0001>

<bundles_post_ra>
// kernel: tpu_custom_call.1
= control target key start
LH: loop header
LB: loop body
LE: loop exit
PB: predicated region body
PF: predicated region fallthrough
CT: control target
= control target key end

     0   :  { %10 = vsyncpa [#allocation3], 0  ;;  %s1308_s0 = inlined_call_operand.hbm [shape: f32[256,128], index: 0, kind: input, shape index: {}]   ;;  %s1309_s1 = inlined_call_operand.hbm [shape: f32[128,128], index: 1, kind: input, shape index: {}]   ;;  %s1310_s2 = inlined_call_operand.hbm [shape: f32[128,128], index: 2, kind: input, shape index: {}]   ;;  %s1311_s3 = inlined_call_operand.hbm [shape: f32[256,128], index: 3, kind: output, shape index: {0}]   ;;  %s1312_s4 = inlined_call_operand.hbm [shape: f32[256,128], index: 4, kind: output, shape index: {1}]  }
   0x1   :  { %12 = vsyncpa [#allocation3 + $0x1], 0 }
   0x2   :  { %13 = vsyncpa [#allocation6], 0 }
   0x3   :  { %14 = vsyncpa [#allocation4], 0 }
   0x4   :  { %16 = vsyncpa [#allocation4 + $0x1], 0 }
   0x5   :  { %17 = vsyncpa [#allocation10], 0 }
   0x6   :  { %19 = vsyncpa [#allocation10 + $0x1], 0  ;;  %s1012_s15 = smov 0   ;;  %s1014_s16 = smov 0  }
   0x7   :  { %s1016_s17 = smov 0   ;;  %s1018_s18 = smov 0  }
   0x8 LB: > { %s1033_s19 = sadd.s32 4294967295, %s979_s18   ;;  %s654_s20 = sadd.s32 4294967294, %s979_s18   ;;  %s979_s18 = sphi %s1018_s18, %s1322_s18   ;;  %s975_s17 = sphi %s1016_s17, %s1321_s17   ;;  %s971_s16 = sphi %s1014_s16, %s1320_s16   ;;  %s967_s15 = sphi %s1012_s15, %s1319_s15  }
   0x9   : > { %p45_p0 = scmp.ne.s32.totalorder %s971_s16, %s967_s15  ;;  %p46_p1 = scmp.eq.s32.totalorder %s1033_s19, 0 }
   0xa   : > { %p111_p2 = scmp.eq.s32.totalorder %s1033_s19, 1  ;;  %p117_p3 = scmp.eq.s32.totalorder %s654_s20, 1 }
   0xb   : > { %p1042_p4 = por %p46_p1, %p45_p0  ;;  %p655_p5 = scmp.ge.s32.totalorder %s979_s18, 1 }
   0xc   : > { %p1047_p6 = por %p117_p3, %p45_p0  ;;  %p150_p7 = scmp.lt.s32.totalorder %s979_s18, 3 }
   0xd   : > { %s161_s25 = sshll.u32 %s1309_s1, 4  ;;  %s981_s27 = smov [#allocation5]   ;;  %s162_s25 = int_to_ptr.hbm [resolvable:$true] %s161_s25 }
   0xe   : > { %p1055_p8 = pnand %p655_p5, %p150_p7  ;;  %s163_s28 = sshll.u32 %s981_s27, 4  ;;  %s164_s28 = int_to_ptr.vmem [resolvable:$true] %s163_s28 }
   0xf   : > { %s175_s5 = sshll.u32 %s1310_s2, 4  ;;  %s982_s6 = smov 128   ;;  %s176_s5 = int_to_ptr.hbm [resolvable:$true] %s175_s5 }
  0x10   : > { %p725_p9 = pneg %p1055_p8  ;;  %s983_s7 = smov 8  }
  0x11   : > { %s984_s8 = smov [#allocation7]   ;;  %s1074_s10 = sadd.s32 1, %s979_s18  }
  0x12   : > { %p726_p10 = pnand %p725_p9, %p46_p1  ;;  %s177_s9 = sshll.u32 %s984_s8, 4  ;;  %s178_s9 = int_to_ptr.vmem [resolvable:$true] %s177_s9 }
  0x13   : > { %s32_s11 = sadd.s32 1, %s975_s17  ;;  %s29_s12 = ssub.s32 %s979_s18, %s1074_s10 }
  0x14   : > { %728 = dma.hbm_to_vmem [thread:$0]  (!%p726_p10), %s162_s25, 2048, %s164_s28, [#allocation6], %s982_s6, %s982_s6, %s983_s7  }
  0x15   : > { %731 = dma.hbm_to_vmem [thread:$0]  (!%p726_p10), %s176_s5, 2048, %s178_s9, [#allocation6], %s982_s6, %s982_s6, %s983_s7  }
  0x16   : > { %p39_p12 = scmp.ne.s32.totalorder %s975_s17, %s971_s16  ;;  %p30_p13 = scmp.eq.s32.totalorder %s29_s12, 0 }
  0x17   : > { %p40_p0 = scmp.eq.s32.totalorder %s979_s18, 0  ;;  %p745_p5 = scmp.lt.s32.totalorder %s979_s18, 2 }
  0x18   : > { %p1084_p3 = por %p111_p2, %p39_p12  ;;  %s191_s20 = sand.u32 1, %s975_s17  }
  0x19   : > { %s1090_s14 = scalar_select %p30_p13, %s975_s17, %s32_s11  }
  0x1a   : > { %p41_p7 = por %p40_p0, %p39_p12  ;;  %s659_s23 = sshll.u32 %s191_s20, 7 }
  0x1b   : > { %s676_s24 = sshll.u32 %s979_s18, 7  ;;  %s195_s29 = scalar_lea.vmem [#allocation2], %s659_s23 }
  0x1c   : > { %s200_s28 = scalar_lea.hbm %s1308_s0, %s676_s24  ;;  %s203_s30 = sshll.u32 %s195_s29, 4  ;;  %s204_s30 = int_to_ptr.vmem [resolvable:$true] %s203_s30 }
  0x1d   : > { %s201_s5 = sshll.u32 %s200_s28, 4  ;;  %p1097_p2 = pnand %p745_p5, %p41_p7  ;;  %s202_s5 = int_to_ptr.hbm [resolvable:$true] %s201_s5 }
  0x1e   : > { %s192_s9 = scalar_lea.sflag [#allocation3], %s191_s20  ;;  %s847_s11 = sshra.s32 %s202_s5, 4  ;;  %s848_s11 = int_to_ptr.hbm [resolvable:$true] %s847_s11 }
  0x1f   : > { %s849_s12 = scalar_lea.hbm %s848_s11, 128  ;;  %p851_p10 = pneg %p1097_p2 }
  0x20   : > { %p850_p9 = scmp.ne.s32.totalorder %s848_s11, %s849_s12  ;;  %s854_s25 = scalar_lea.hbm %s1308_s0, 256 }
  0x21   : > { %p855_p0 = scmp.lt.s32.totalorder %s848_s11, %s1308_s0  ;;  %p856_p5 = scmp.lt.s32.totalorder %s854_s25, %s849_s12 }
  0x22   : > { %p852_p12 = pnand %p851_p10, %p850_p9 }
  0x23   : > { %p857_p7 = por %p856_p5, %p855_p0 }
  0x24   : > { %p853_p13 = pneg %p852_p12 }
  0x26   : > { %p858_p11 = pnand %p857_p7, %p853_p13 }
  0x28   : > { %861 = shalt.err (!%p858_p11)
}
  0x29   : > { %735 = dma.hbm_to_vmem [thread:$0]  (!%p1097_p2), %s202_s5, 2048, %s204_s30, %s192_s9, %s982_s6, %s982_s6, %s983_s7  }
  0x2a   : > { %215 = sbr.rel (%p1055_p8) target bundleno = 418 (0x1a2), region = 32  ;;  %s1117_s20 = sand.u32 (!%p1055_p8), 1, %s971_s16  }
  0x2b   : > { %s1120_s29 = sshll.u32 (!%p1055_p8), %s1117_s20, 7  ;;  %s218_s11 = scalar_lea.sflag (!%p1055_p8), [#allocation3], %s1117_s20 }
  0x2c   : > { %s1124_s12 = scalar_lea.vmem (!%p1055_p8), [#allocation2], %s1120_s29 }
  0x2f   : > { %950 = dma.done.wait (%p1042_p4), %s218_s11, 2048  }
  0x30   : > { %952 = vsyncadd (%p1042_p4), %s218_s11, 4294965248 }
  0x31   : > { %954 = dma.done.wait (%p46_p1), [#allocation6], 4096  }
  0x32   : > { %956 = vsyncadd (%p46_p1), [#allocation6], 4294963200  ;;  %v296_v0 = vld [vmem:[#allocation5 + $0x78] sm:$0xff]  ;;  %v295_v1 = vld [vmem:[#allocation5 + $0x70] sm:$0xff]  ;;  %s1199_s21 = scalar_lea.vmem [#allocation8], %s1120_s29  ;;  %s1204_s26 = scalar_lea.vmem [#allocation9], %s1120_s29 }
  0x33   : > { %679 = vmatpush.msra.mxu2 %v296_v0  ;;  %297 = vmatpush.msra.mxu0 %v296_v0  ;;  %v294_v2 = vld [vmem:[#allocation5 + $0x68] sm:$0xff]  ;;  %v293_v3 = vld [vmem:[#allocation5 + $0x60] sm:$0xff]  ;;  %v292_v4 = vld [vmem:[#allocation5 + $0x58] sm:$0xff]  ;;  %s677_s6 = sshll.u32 %s1033_s19, 7  ;;  %s509_s8 = sshll.u32 %s1199_s21, 4  ;;  %s510_s8 = int_to_ptr.vmem [resolvable:$true] %s509_s8 }
  0x34   : > { %v291_v5 = vld [vmem:[#allocation5 + $0x50] sm:$0xff]  ;;  %v290_v6 = vld [vmem:[#allocation5 + $0x48] sm:$0xff]  ;;  %v289_v7 = vld [vmem:[#allocation5 + $0x40] sm:$0xff]  ;;  %s508_s5 = scalar_lea.hbm %s1311_s3, %s677_s6  ;;  %s525_s19 = scalar_lea.hbm %s1312_s4, %s677_s6 }
  0x35   : > { %680 = vmatpush.msra.mxu2 %v295_v1  ;;  %298 = vmatpush.msra.mxu0 %v295_v1  ;;  %v288_v8 = vld [vmem:[#allocation5 + $0x38] sm:$0xff]  ;;  %v287_v9 = vld [vmem:[#allocation5 + $0x30] sm:$0xff]  ;;  %v286_v10 = vld [vmem:[#allocation5 + $0x28] sm:$0xff]  ;;  %s511_s9 = sshll.u32 %s508_s5, 4  ;;  %s526_s25 = sshll.u32 %s1204_s26, 4  ;;  %s512_s9 = int_to_ptr.hbm [resolvable:$true] %s511_s9  ;;  %s1260_s25 = int_to_ptr.vmem [resolvable:$true] %s526_s25 }
  0x36   : > { %v285_v11 = vld [vmem:[#allocation5 + $0x20] sm:$0xff]  ;;  %v284_v12 = vld [vmem:[#allocation5 + $0x18] sm:$0xff]  ;;  %v283_v13 = vld [vmem:[#allocation5 + $0x10] sm:$0xff]  ;;  %s528_s27 = sshll.u32 %s525_s19, 4  ;;  %s492_s28 = scalar_lea.sflag [#allocation4], %s1117_s20  ;;  %s1262_s27 = int_to_ptr.hbm [resolvable:$true] %s528_s27 }
  0x37   : > { %681 = vmatpush.msra.mxu2 %v294_v2  ;;  %299 = vmatpush.msra.mxu0 %v294_v2  ;;  %v282_v14 = vld [vmem:[#allocation5 + $0x8] sm:$0xff]  ;;  %v281_v15 = vld [vmem:[#allocation5] sm:$0xff]  ;;  %v1151_v20 = vld [vmem:[%s1124_s12 + $0x50] sm:$0xff]  ;;  %s891_s29 = sshra.s32 %s512_s9, 4  ;;  %s897_s7 = scalar_lea.hbm %s1311_s3, 256  ;;  %s892_s29 = int_to_ptr.hbm [resolvable:$true] %s891_s29 }
  0x38   : > { %v1135_v16 = vld [vmem:[%s1124_s12 + $0x40] sm:$0xff]  ;;  %v1143_v18 = vld [vmem:[%s1124_s12 + $0x48] sm:$0xff]  ;;  %v1154_v21 = vld [vmem:[%s1124_s12 + $0x10] sm:$0xff]  ;;  %s893_s11 = scalar_lea.hbm %s892_s29, 128  ;;  %p898_p11 = scmp.lt.s32.totalorder %s892_s29, %s1311_s3 }
  0x39   : > { %682 = vmatpush.msra.mxu2 %v293_v3  ;;  %300 = vmatpush.msra.mxu0 %v293_v3  ;;  %v1138_v17 = vld [vmem:[%s1124_s12] sm:$0xff]  ;;  %v1146_v19 = vld [vmem:[%s1124_s12 + $0x8] sm:$0xff]  ;;  %v1159_v22 = vld [vmem:[%s1124_s12 + $0x58] sm:$0xff]  ;;  %p894_p1 = scmp.ne.s32.totalorder %s892_s29, %s893_s11  ;;  %p899_p2 = scmp.lt.s32.totalorder %s897_s7, %s893_s11 }
  0x3a   : > { %v1162_v23 = vld [vmem:[%s1124_s12 + $0x18] sm:$0xff]  ;;  %v376_v25 = vld [vmem:[#allocation7 + $0x70] sm:$0xff]  ;;  %v375_v26 = vld [vmem:[#allocation7 + $0x68] sm:$0xff] }
  0x3b   : > { %683 = vmatpush.msra.mxu2 %v292_v4  ;;  %301 = vmatpush.msra.mxu0 %v292_v4  ;;  %v377_v24 = vld [vmem:[#allocation7 + $0x78] sm:$0xff]  ;;  %v374_v27 = vld [vmem:[#allocation7 + $0x60] sm:$0xff]  ;;  %v372_v31 = vld [vmem:[#allocation7 + $0x50] sm:$0xff]  ;;  %p895_p4 = pnand %p894_p1, %p1084_p3  ;;  %p900_p9 = por %p899_p2, %p898_p11 }
  0x3c   : > { %695 = vmatpush.msra.mxu3 %v377_v24  ;;  %378 = vmatpush.msra.mxu1 %v377_v24  ;;  %v1167_v28 = vld [vmem:[%s1124_s12 + $0x60] sm:$0xff]  ;;  %v373_v30 = vld [vmem:[#allocation7 + $0x58] sm:$0xff]  ;;  %v371_v32 = vld [vmem:[#allocation7 + $0x48] sm:$0xff] }
  0x3d   : > { %684 = vmatpush.msra.mxu2 %v291_v5  ;;  %302 = vmatpush.msra.mxu0 %v291_v5  ;;  %v1170_v29 = vld [vmem:[%s1124_s12 + $0x20] sm:$0xff]  ;;  %v1175_v34 = vld [vmem:[%s1124_s12 + $0x68] sm:$0xff]  ;;  %v369_v36 = vld [vmem:[#allocation7 + $0x38] sm:$0xff]  ;;  %p896_p8 = pneg %p895_p4 }
  0x3e   : > { %696 = vmatpush.msra.mxu3 %v376_v25  ;;  %379 = vmatpush.msra.mxu1 %v376_v25  ;;  %v370_v33 = vld [vmem:[#allocation7 + $0x40] sm:$0xff]  ;;  %v1178_v35 = vld [vmem:[%s1124_s12 + $0x28] sm:$0xff]  ;;  %v368_v37 = vld [vmem:[#allocation7 + $0x30] sm:$0xff] }
  0x3f   : > { %685 = vmatpush.msra.mxu2 %v290_v6  ;;  %303 = vmatpush.msra.mxu0 %v290_v6  ;;  %v367_v38 = vld [vmem:[#allocation7 + $0x28] sm:$0xff]  ;;  %v366_v39 = vld [vmem:[#allocation7 + $0x20] sm:$0xff]  ;;  %v1183_v40 = vld [vmem:[%s1124_s12 + $0x70] sm:$0xff]  ;;  %p901_p10 = pnand %p900_p9, %p896_p8 }
  0x40   : > { %697 = vmatpush.msra.mxu3 %v375_v26  ;;  %380 = vmatpush.msra.mxu1 %v375_v26  ;;  %v1186_v41 = vld [vmem:[%s1124_s12 + $0x30] sm:$0xff]  ;;  %v365_v42 = vld [vmem:[#allocation7 + $0x18] sm:$0xff]  ;;  %v363_v44 = vld [vmem:[#allocation7 + $0x8] sm:$0xff] }
  0x41   : > { %686 = vmatpush.msra.mxu2 %v289_v7  ;;  %304 = vmatpush.msra.mxu0 %v289_v7  ;;  %v364_v43 = vld [vmem:[#allocation7 + $0x10] sm:$0xff]  ;;  %v1191_v45 = vld [vmem:[%s1124_s12 + $0x78] sm:$0xff]  ;;  %v362_v47 = vld [vmem:[#allocation7] sm:$0xff] }
  0x42   : > { %698 = vmatpush.msra.mxu3 %v374_v27  ;;  %381 = vmatpush.msra.mxu1 %v374_v27  ;;  %v1194_v46 = vld [vmem:[%s1124_s12 + $0x38] sm:$0xff] }
  0x43   : > { %687 = vmatpush.msra.mxu2 %v288_v8  ;;  %305 = vmatpush.msra.mxu0 %v288_v8 }
  0x44   : > { %699 = vmatpush.msra.mxu3 %v373_v30  ;;  %382 = vmatpush.msra.mxu1 %v373_v30 }
  0x45   : > { %688 = vmatpush.msra.mxu2 %v287_v9  ;;  %306 = vmatpush.msra.mxu0 %v287_v9 }
  0x46   : > { %700 = vmatpush.msra.mxu3 %v372_v31  ;;  %383 = vmatpush.msra.mxu1 %v372_v31 }
  0x47   : > { %689 = vmatpush.msra.mxu2 %v286_v10  ;;  %307 = vmatpush.msra.mxu0 %v286_v10 }
  0x48   : > { %701 = vmatpush.msra.mxu3 %v371_v32  ;;  %384 = vmatpush.msra.mxu1 %v371_v32 }
  0x49   : > { %690 = vmatpush.msra.mxu2 %v285_v11  ;;  %308 = vmatpush.msra.mxu0 %v285_v11 }
  0x4a   : > { %702 = vmatpush.msra.mxu3 %v370_v33  ;;  %385 = vmatpush.msra.mxu1 %v370_v33 }
  0x4b   : > { %691 = vmatpush.msra.mxu2 %v284_v12  ;;  %309 = vmatpush.msra.mxu0 %v284_v12 }
  0x4c   : > { %703 = vmatpush.msra.mxu3 %v369_v36  ;;  %386 = vmatpush.msra.mxu1 %v369_v36 }
  0x4d   : > { %692 = vmatpush.msra.mxu2 %v283_v13  ;;  %310 = vmatpush.msra.mxu0 %v283_v13 }
  0x4e   : > { %704 = vmatpush.msra.mxu3 %v368_v37  ;;  %387 = vmatpush.msra.mxu1 %v368_v37 }
  0x4f   : > { %693 = vmatpush.msra.mxu2 %v282_v14  ;;  %311 = vmatpush.msra.mxu0 %v282_v14 }
  0x50   : > { %705 = vmatpush.msra.mxu3 %v367_v38  ;;  %388 = vmatpush.msra.mxu1 %v367_v38 }
  0x51   : > { %694 = vmatpush.msra.mxu2 %v281_v15  ;;  %312 = vmatpush.msra.mxu0 %v281_v15 }
  0x52   : > { %337 = vmatmul.f32.vlgmr.msra.gmra.mxu2 %v1135_v16  ;;  %313 = vmatmul.f32.vlgmr.msra.gmra.mxu0 %v1138_v17 }
  0x53   : > { %706 = vmatpush.msra.mxu3 %v366_v39  ;;  %389 = vmatpush.msra.mxu1 %v366_v39 }
  0x55   : > { %707 = vmatpush.msra.mxu3 %v365_v42  ;;  %390 = vmatpush.msra.mxu1 %v365_v42 }
  0x57   : > { %708 = vmatpush.msra.mxu3 %v364_v43  ;;  %391 = vmatpush.msra.mxu1 %v364_v43 }
  0x59   : > { %709 = vmatpush.msra.mxu3 %v363_v44  ;;  %392 = vmatpush.msra.mxu1 %v363_v44 }
  0x5a   : > { %340 = vmatmul.f32.gmra.mxu2 %v1143_v18  ;;  %316 = vmatmul.f32.gmra.mxu0 %v1146_v19 }
  0x5b   : > { %710 = vmatpush.msra.mxu3 %v362_v47  ;;  %393 = vmatpush.msra.mxu1 %v362_v47 }
  0x62   : > { %343 = vmatmul.f32.gmra.mxu2 %v1151_v20  ;;  %319 = vmatmul.f32.gmra.mxu0 %v1154_v21 }
  0x6a   : > { %346 = vmatmul.f32.gmra.mxu2 %v1159_v22  ;;  %322 = vmatmul.f32.gmra.mxu0 %v1162_v23 }
  0x72   : > { %349 = vmatmul.f32.gmra.mxu2 %v1167_v28  ;;  %325 = vmatmul.f32.gmra.mxu0 %v1170_v29 }
  0x7a   : > { %352 = vmatmul.f32.gmra.mxu2 %v1175_v34  ;;  %328 = vmatmul.f32.gmra.mxu0 %v1178_v35 }
  0x82   : > { %355 = vmatmul.f32.gmra.mxu2 %v1183_v40  ;;  %331 = vmatmul.f32.gmra.mxu0 %v1186_v41 }
  0x8a   : > { %358 = vmatmul.f32.gmra.mxu2 %v1191_v45  ;;  %334 = vmatmul.f32.gmra.mxu0 %v1194_v46 }
  0xcf   : > { %v314_v48 = vpop.f32.mrf.mxu0 }
  0xd0   : > { %394 = vmatmul.f32.vlgmr.msra.gmra.mxu1 %v314_v48 }
  0xd5   : > { %v338_v49 = vpop.f32.mrf.mxu2 }
  0xd6   : > { %418 = vmatmul.f32.vlgmr.msra.gmra.mxu3 %v338_v49 }
  0xd7   : > { %v317_v50 = vpop.f32.mrf.mxu0 }
  0xd8   : > { %397 = vmatmul.f32.gmra.mxu1 %v317_v50 }
  0xdd   : > { %v341_v51 = vpop.f32.mrf.mxu2 }
  0xde   : > { %421 = vmatmul.f32.gmra.mxu3 %v341_v51 }
  0xdf   : > { %v320_v52 = vpop.f32.mrf.mxu0 }
  0xe0   : > { %400 = vmatmul.f32.gmra.mxu1 %v320_v52 }
  0xe5   : > { %v344_v53 = vpop.f32.mrf.mxu2 }
  0xe6   : > { %424 = vmatmul.f32.gmra.mxu3 %v344_v53 }
  0xe7   : > { %v323_v54 = vpop.f32.mrf.mxu0 }
  0xe8   : > { %403 = vmatmul.f32.gmra.mxu1 %v323_v54 }
  0xed   : > { %v347_v55 = vpop.f32.mrf.mxu2 }
  0xee   : > { %427 = vmatmul.f32.gmra.mxu3 %v347_v55 }
  0xef   : > { %v326_v56 = vpop.f32.mrf.mxu0 }
  0xf0   : > { %406 = vmatmul.f32.gmra.mxu1 %v326_v56 }
  0xf5   : > { %v350_v57 = vpop.f32.mrf.mxu2 }
  0xf6   : > { %430 = vmatmul.f32.gmra.mxu3 %v350_v57 }
  0xf7   : > { %v329_v58 = vpop.f32.mrf.mxu0 }
  0xf8   : > { %409 = vmatmul.f32.gmra.mxu1 %v329_v58 }
  0xfd   : > { %v353_v59 = vpop.f32.mrf.mxu2 }
  0xfe   : > { %433 = vmatmul.f32.gmra.mxu3 %v353_v59 }
  0xff   : > { %v332_v60 = vpop.f32.mrf.mxu0 }
 0x100   : > { %412 = vmatmul.f32.gmra.mxu1 %v332_v60 }
 0x105   : > { %v356_v61 = vpop.f32.mrf.mxu2 }
 0x106   : > { %436 = vmatmul.f32.gmra.mxu3 %v356_v61 }
 0x107   : > { %v335_v62 = vpop.f32.mrf.mxu0 }
 0x108   : > { %415 = vmatmul.f32.gmra.mxu1 %v335_v62 }
 0x10d   : > { %v359_v63 = vpop.f32.mrf.mxu2 }
 0x10e   : > { %439 = vmatmul.f32.gmra.mxu3 %v359_v63 }
 0x14d   : > { %v395_v0 = vpop.f32.mrf.mxu1 }
 0x14e   : > { %443 = vst [vmem:[%s1199_s21] sm:$0xff] %v395_v0  ;;  %v459_v1 = vadd.f32 %v395_v0, %v1138_v17 }
 0x150   : > { %475 = vst [vmem:[%s1204_s26] sm:$0xff] %v459_v1 }
 0x155   : > { %v398_v2 = vpop.f32.mrf.mxu1 }
 0x156   : > { %444 = vst [vmem:[%s1199_s21 + $0x8] sm:$0xff] %v398_v2  ;;  %v460_v3 = vadd.f32 %v398_v2, %v1146_v19 }
 0x158   : > { %476 = vst [vmem:[%s1204_s26 + $0x8] sm:$0xff] %v460_v3 }
 0x159   : > { %v419_v4 = vpop.f32.mrf.mxu3 }
 0x15a   : > { %451 = vst [vmem:[%s1199_s21 + $0x40] sm:$0xff] %v419_v4  ;;  %v467_v5 = vadd.f32 %v419_v4, %v1135_v16 }
 0x15c   : > { %483 = vst [vmem:[%s1204_s26 + $0x40] sm:$0xff] %v467_v5 }
 0x15d   : > { %v401_v6 = vpop.f32.mrf.mxu1 }
 0x15e   : > { %445 = vst [vmem:[%s1199_s21 + $0x10] sm:$0xff] %v401_v6  ;;  %v461_v7 = vadd.f32 %v401_v6, %v1154_v21 }
 0x160   : > { %477 = vst [vmem:[%s1204_s26 + $0x10] sm:$0xff] %v461_v7 }
 0x161   : > { %v422_v8 = vpop.f32.mrf.mxu3 }
 0x162   : > { %452 = vst [vmem:[%s1199_s21 + $0x48] sm:$0xff] %v422_v8  ;;  %v468_v9 = vadd.f32 %v422_v8, %v1143_v18 }
 0x164   : > { %484 = vst [vmem:[%s1204_s26 + $0x48] sm:$0xff] %v468_v9 }
 0x165   : > { %v404_v10 = vpop.f32.mrf.mxu1 }
 0x166   : > { %446 = vst [vmem:[%s1199_s21 + $0x18] sm:$0xff] %v404_v10  ;;  %v462_v11 = vadd.f32 %v404_v10, %v1162_v23 }
 0x168   : > { %478 = vst [vmem:[%s1204_s26 + $0x18] sm:$0xff] %v462_v11 }
 0x169   : > { %v425_v12 = vpop.f32.mrf.mxu3 }
 0x16a   : > { %453 = vst [vmem:[%s1199_s21 + $0x50] sm:$0xff] %v425_v12  ;;  %v469_v13 = vadd.f32 %v425_v12, %v1151_v20 }
 0x16c   : > { %485 = vst [vmem:[%s1204_s26 + $0x50] sm:$0xff] %v469_v13 }
 0x16d   : > { %v407_v14 = vpop.f32.mrf.mxu1 }
 0x16e   : > { %447 = vst [vmem:[%s1199_s21 + $0x20] sm:$0xff] %v407_v14  ;;  %v463_v15 = vadd.f32 %v407_v14, %v1170_v29 }
 0x170   : > { %479 = vst [vmem:[%s1204_s26 + $0x20] sm:$0xff] %v463_v15 }
 0x171   : > { %v428_v16 = vpop.f32.mrf.mxu3 }
 0x172   : > { %454 = vst [vmem:[%s1199_s21 + $0x58] sm:$0xff] %v428_v16  ;;  %v470_v17 = vadd.f32 %v428_v16, %v1159_v22 }
 0x174   : > { %486 = vst [vmem:[%s1204_s26 + $0x58] sm:$0xff] %v470_v17 }
 0x175   : > { %v410_v18 = vpop.f32.mrf.mxu1 }
 0x176   : > { %448 = vst [vmem:[%s1199_s21 + $0x28] sm:$0xff] %v410_v18  ;;  %v464_v19 = vadd.f32 %v410_v18, %v1178_v35 }
 0x178   : > { %480 = vst [vmem:[%s1204_s26 + $0x28] sm:$0xff] %v464_v19 }
 0x179   : > { %v431_v20 = vpop.f32.mrf.mxu3 }
 0x17a   : > { %455 = vst [vmem:[%s1199_s21 + $0x60] sm:$0xff] %v431_v20  ;;  %v471_v21 = vadd.f32 %v431_v20, %v1167_v28 }
 0x17c   : > { %487 = vst [vmem:[%s1204_s26 + $0x60] sm:$0xff] %v471_v21 }
 0x17d   : > { %v413_v23 = vpop.f32.mrf.mxu1 }
 0x17e   : > { %449 = vst [vmem:[%s1199_s21 + $0x30] sm:$0xff] %v413_v23  ;;  %v465_v22 = vadd.f32 %v413_v23, %v1186_v41 }
 0x180   : > { %481 = vst [vmem:[%s1204_s26 + $0x30] sm:$0xff] %v465_v22 }
 0x181   : > { %v434_v24 = vpop.f32.mrf.mxu3 }
 0x182   : > { %456 = vst [vmem:[%s1199_s21 + $0x68] sm:$0xff] %v434_v24  ;;  %v472_v25 = vadd.f32 %v434_v24, %v1175_v34 }
 0x184   : > { %488 = vst [vmem:[%s1204_s26 + $0x68] sm:$0xff] %v472_v25 }
 0x185   : > { %v416_v26 = vpop.f32.mrf.mxu1 }
 0x186   : > { %450 = vst [vmem:[%s1199_s21 + $0x38] sm:$0xff] %v416_v26  ;;  %v466_v27 = vadd.f32 %v416_v26, %v1194_v46 }
 0x188   : > { %482 = vst [vmem:[%s1204_s26 + $0x38] sm:$0xff] %v466_v27 }
 0x189   : > { %v437_v28 = vpop.f32.mrf.mxu3 }
 0x18a   : > { %457 = vst [vmem:[%s1199_s21 + $0x70] sm:$0xff] %v437_v28  ;;  %v473_v29 = vadd.f32 %v437_v28, %v1183_v40 }
 0x18c   : > { %489 = vst [vmem:[%s1204_s26 + $0x70] sm:$0xff] %v473_v29 }
 0x191   : > { %v440_v30 = vpop.f32.mrf.mxu3 }
 0x192   : > { %458 = vst [vmem:[%s1199_s21 + $0x78] sm:$0xff] %v440_v30  ;;  %v474_v31 = vadd.f32 %v440_v30, %v1191_v45 }
 0x193   : > { %904 = shalt.err (!%p901_p10)
}
 0x194   : > { %s985_s5 = smov 128   ;;  %s986_s24 = smov 8   ;;  %490 = vst [vmem:[%s1204_s26 + $0x78] sm:$0xff] %v474_v31 }
 0x195   : > { %721 = dma.vmem_to_hbm [thread:$0]  (%p1084_p3), %s510_s8, 2048, %s512_s9, %s492_s28, %s985_s5, %s985_s5, %s986_s24  }
 0x196   : > { %s497_s23 = scalar_lea.sflag [#allocation10], %s1117_s20  ;;  %s919_s19 = sshra.s32 %s1262_s27, 4  ;;  %s920_s19 = int_to_ptr.hbm [resolvable:$true] %s919_s19 }
 0x197   : > { %s921_s12 = scalar_lea.hbm %s920_s19, 128  ;;  %s925_s6 = scalar_lea.hbm %s1312_s4, 256 }
 0x198   : > { %p922_p12 = scmp.ne.s32.totalorder %s920_s19, %s921_s12  ;;  %p926_p5 = scmp.lt.s32.totalorder %s920_s19, %s1312_s4 }
 0x199   : > { %p927_p7 = scmp.lt.s32.totalorder %s925_s6, %s921_s12 }
 0x19a   : > { %p923_p13 = pnand %p922_p12, %p1084_p3 }
 0x19b   : > { %p928_p1 = por %p927_p7, %p926_p5 }
 0x19c   : > { %p924_p0 = pneg %p923_p13 }
 0x19e   : > { %p929_p4 = pnand %p928_p1, %p924_p0 }
 0x1a0   : > { %932 = shalt.err (!%p929_p4)
}
 0x1a1   : > { %722 = dma.vmem_to_hbm [thread:$0]  (%p1084_p3), %s1260_s25, 2048, %s1262_s27, %s497_s23, %s985_s5, %s985_s5, %s986_s24  }
 0x1a2 PF: > { %s543_s20 = sand.u32 1, %s967_s15   ;;  %p1318_p8 = scmp.ge.s32.totalorder %s979_s18, 2 }
 0x1a3   : > { %s544_s26 = scalar_lea.sflag [#allocation4], %s543_s20 }
 0x1a4   : > { %p737_p11 = pnand %p1318_p8, %p1047_p6 }
 0x1a6   : > { %p738_p2 = pneg %p737_p11 }
 0x1a8   : > { %958 = dma.done.wait (%p738_p2), %s544_s26, 2048  }
 0x1a9   : > { %960 = vsyncadd (%p738_p2), %s544_s26, 4294965248  ;;  %s554_s8 = scalar_lea.sflag [#allocation10], %s543_s20 }
 0x1aa   : > { %962 = dma.done.wait (%p738_p2), %s554_s8, 2048  }
 0x1ab   : > { %964 = vsyncadd (%p738_p2), %s554_s8, 4294965248  ;;  %p22_p3 = scmp.ge.s32.totalorder %s1074_s10, 4   ;;  %s1319_s15 = smov %s971_s16 }
 0x1ac   : > { %s1320_s16 = smov %s975_s17  ;;  %s1321_s17 = smov %s1090_s14 }
 0x1ad   : > { %s1322_s18 = smov %s1074_s10  ;;  %24 = sbr.rel (!%p22_p3) target bundleno = 8 (0x8), region = 102 }
 0x1b2   :  { %560 = vsyncpa [#allocation3], 1 }
 0x1b3   :  { %562 = vsyncpa [#allocation3 + $0x1], 1 }
 0x1b4   :  { %563 = vsyncpa [#allocation6], 1 }
 0x1b5   :  { %564 = vsyncpa [#allocation4], 1 }
 0x1b6   :  { %566 = vsyncpa [#allocation4 + $0x1], 1 }
 0x1b7   :  { %567 = vsyncpa [#allocation10], 1 }
 0x1b8   :  { %569 = vsyncpa [#allocation10 + $0x1], 1 }

</bundles_post_ra>
